<compile_context>
chip_gen: v6e
topology: v6e:2x2x1
jax: 0.10.0
libtpu: 0.0.40
codegen_flags: <defaults>
</compile_context>

<pallas_src>
import functools

import jax
import jax.numpy as jnp
from jax import lax
from jax.experimental import pallas as pl
from jax.experimental.pallas import tpu as pltpu

# Finite "-inf" so the padding mask never creates inf/NaN arithmetic in-kernel.
_MASK_VALUE = float(jnp.finfo(jnp.float32).min)


def _contrastive_kernel(f1_ref, f2_ref, loss_ref, m_scr, l_scr, pos_scr, *,
                        inv_temperature, valid_b, padded_b):
    """One (query-tile qi, key-tile ki) step of online-logsumexp InfoNCE.

    f1_ref  : (T, D) query tile of features1 (block index independent of ki,
              so it stays resident in VMEM across the whole key sweep).
    f2_ref  : (T, D) key tile of features2 (streams along the reduction axis).
    loss_ref: (1, T) lane-dense per-row loss block, written once at ki == nk-1.
    m_scr / l_scr / pos_scr : (1, T) running row max / softmax denominator /
              positive (diagonal) logit — queries indexed along the LANE axis.
    """
    qi = pl.program_id(0)
    ki = pl.program_id(1)
    nk = pl.num_programs(1)

    @pl.when(ki == 0)
    def _init():
        m_scr[...] = jnp.full_like(m_scr, -jnp.inf)
        l_scr[...] = jnp.zeros_like(l_scr)

    tn = f2_ref.shape[0]

    # simT[k, q] = (f2_k . f1_q) / T.  Keys on sublanes, queries on lanes.
    # Inputs stay in their native dtype (bf16 stays bf16 on the MXU); f32
    # accumulation via preferred_element_type.  No explicit transpose: the
    # contraction is over the last dim of both operands.
    simT = lax.dot_general(
        f2_ref[...], f1_ref[...],
        dimension_numbers=(((1,), (1,)), ((), ())),
        preferred_element_type=jnp.float32) * inv_temperature   # (TN, TQ) f32

    if padded_b != valid_b:
        # Static padding path: mask padded KEY rows out of the logsumexp.
        key_idx = ki * tn + lax.broadcasted_iota(jnp.int32, simT.shape, 0)
        simT = jnp.where(key_idx < valid_b, simT, _MASK_VALUE)

    # Positive (diagonal) term: with TQ == TN and aligned tiling the positives
    # for query tile qi sit on the diagonal of key tile ki == qi.  One masked
    # sublane reduction per q-tile; no separate (TQ, D) positives stream.  It
    # also reuses the exact MXU value that enters the logsumexp, so lse - pos
    # is numerically self-consistent.
    @pl.when(ki == qi)
    def _positives():
        diag = (lax.broadcasted_iota(jnp.int32, simT.shape, 0) ==
                lax.broadcasted_iota(jnp.int32, simT.shape, 1))
        pos_scr[...] = jnp.sum(jnp.where(diag, simT, 0.0), axis=0, keepdims=True)

    # Flash-style online logsumexp update (all softmax math in f32).  All
    # reductions are over axis 0 (sublanes) -> mostly VALU, tiny XLU finish.
    m_prev = m_scr[...]
    m_new = jnp.maximum(m_prev, jnp.max(simT, axis=0, keepdims=True))    # (1, TQ)
    # TODO(synk): if a bundle profile shows the single EUP slot binding on
    # v6e/v7x, compute this exp in bf16 (not on v5e) and/or push the key-sum
    # onto the idle MXU via a ones-(1, TN) matmul.
    p = jnp.exp(simT - m_new)                                            # (TN, TQ)
    alpha = jnp.exp(m_prev - m_new)
    l_scr[...] = alpha * l_scr[...] + jnp.sum(p, axis=0, keepdims=True)
    m_scr[...] = m_new

    @pl.when(ki == nk - 1)
    def _finalize():
        # loss_q = logsumexp_k(sim_qk) - sim_qq ; single lane-dense (1, TQ) store.
        loss_ref[...] = m_scr[...] + jnp.log(l_scr[...]) - pos_scr[...]


def _select_tile(b, d, itemsize, requested, vmem_cap):
    """Single batch tile T (TQ == TN): a multiple of 128 that fits the per-chip
    VMEM budget with both input streams double-buffered, capped so the
    'parallel' query axis has >= 2 tiles whenever B > 128 (v7x megacore)."""
    if requested is not None:
        t = max(128, (int(requested) // 128) * 128)
    else:
        budget = vmem_cap // 4            # headroom for pipelining + compiler scratch
        # live tile VMEM ~= 2 buffers x (f1 tile + f2 tile) = 4 * t * d * itemsize
        t = budget // max(1, 4 * d * itemsize)
        t = max(128, min((t // 128) * 128, 512))   # >512: per-step overhead already amortized
    if b > 128:
        # Keep at least two query tiles so the parallel axis can shard across
        # v7x's two TensorCores (nq == 1 would serialize onto one core).
        half = ((b + 1) // 2 + 127) // 128 * 128
        t = min(t, max(128, half))
    return t


def _vmem_limit_bytes(t, d, itemsize, vmem_cap):
    """Explicit scoped-VMEM budget: double-buffered f1 + f2 tiles, the
    lane-dense output block, three (1, T) scratch rows, plus margin."""
    live = (2 * 2 * t * d * itemsize) + (2 * 2 * t * 4) + (3 * t * 4)
    want = max(2 * live + (4 << 20), 32 << 20)
    return int(min(want, max(vmem_cap - (8 << 20), 16 << 20)))


def contrastive_loss(features1, features2, temperature=0.1, block=None):
    """Pallas-backed contrastive (InfoNCE) loss.

    features1, features2: (B, D).  Returns a scalar f32 loss.
    """
    b, d = features1.shape
    itemsize = jnp.dtype(features1.dtype).itemsize
    try:
        vmem_cap = int(pltpu.get_tpu_info().vmem_capacity_bytes)
    except Exception:
        vmem_cap = 64 * 1024 * 1024       # v7x physical VMEM = smallest in the fleet

    t = _select_tile(b, d, itemsize, block, vmem_cap)
    b_padded = pl.cdiv(b, t) * t
    if b_padded != b:
        pad = b_padded - b
        features1 = jnp.pad(features1, ((0, pad), (0, 0)))
        features2 = jnp.pad(features2, ((0, pad), (0, 0)))
    n_tiles = b_padded // t               # nq == nk (TQ == TN, shared padding)

    # NOTE: temperature is static (recompiles per distinct value); acceptable
    # since it is a fixed hyperparameter in the reference module.
    kernel = functools.partial(
        _contrastive_kernel,
        inv_temperature=float(1.0 / temperature),
        valid_b=int(b), padded_b=int(b_padded))

    per_row = pl.pallas_call(
        kernel,
        out_shape=jax.ShapeDtypeStruct((1, b_padded), jnp.float32),
        grid=(n_tiles, n_tiles),
        in_specs=[
            # f1 query tile: resident across the whole key sweep.
            pl.BlockSpec((t, d), lambda qi, ki: (qi, 0)),
            # f2 key tile: streams along the reduction axis.  (If a profile
            # shows exposed key DMA for tiny D, bump to pipeline_mode=
            # pl.Buffered(3) — skipped here to keep v7x VMEM headroom.)
            pl.BlockSpec((t, d), lambda qi, ki: (ki, 0)),
        ],
        out_specs=pl.BlockSpec((1, t), lambda qi, ki: (0, qi)),  # lane-dense row
        scratch_shapes=[
            pltpu.VMEM((1, t), jnp.float32),   # running row max
            pltpu.VMEM((1, t), jnp.float32),   # running softmax denominator
            pltpu.VMEM((1, t), jnp.float32),   # positive (diagonal) logit
        ],
        compiler_params=pltpu.CompilerParams(
            dimension_semantics=("parallel", "arbitrary"),
            vmem_limit_bytes=_vmem_limit_bytes(t, d, itemsize, vmem_cap)),
    )(features1, features2)

    # Only the first B entries are real queries; the padded tail is dropped.
    return jnp.sum(per_row[0, :b]) / b


def _reference_loss(f1, f2, temperature=0.1):
    sim = (f1.astype(jnp.float32) @ f2.astype(jnp.float32).T) / temperature
    lse = jax.scipy.special.logsumexp(sim, axis=-1)
    pos = jnp.sum(f1.astype(jnp.float32) * f2.astype(jnp.float32),
                  axis=-1) / temperature
    return jnp.mean(lse - pos)


if __name__ == "__main__":
    key = jax.random.PRNGKey(0)
    k1, k2 = jax.random.split(key)
    # B=200 is deliberately NOT a multiple of the 128 tile: it exercises the
    # pad-and-mask path and yields a real (2, 2) grid — two query tiles so the
    # "parallel" axis can actually shard on a two-TensorCore chip.
    B, D = 200, 64
    features1 = jax.random.normal(k1, (B, D), dtype=jnp.float32)
    features2 = jax.random.normal(k2, (B, D), dtype=jnp.float32)
    # L2-normalize (typical contrastive inputs; keeps logits well scaled).
    features1 = features1 / jnp.linalg.norm(features1, axis=-1, keepdims=True)
    features2 = features2 / jnp.linalg.norm(features2, axis=-1, keepdims=True)

    loss = contrastive_loss(features1, features2, temperature=0.1)
    loss = jax.block_until_ready(loss)

    ref = jax.block_until_ready(_reference_loss(features1, features2, 0.1))
    assert jnp.allclose(loss, ref, rtol=1e-5, atol=1e-5), (loss, ref)

    print("KERNEL_OK")
</pallas_src>

<mosaic_0001>
module attributes {stable_mosaic.version = 11 : i64} {
  func.func @_contrastive_kernel(%arg0: i32, %arg1: i32, %arg2: memref<128x64xf32, #tpu.memory_space<vmem>>, %arg3: memref<128x64xf32, #tpu.memory_space<vmem>>, %arg4: memref<1x128xf32, #tpu.memory_space<vmem>>, %arg5: memref<1x128xf32, #tpu.memory_space<vmem>>, %arg6: memref<1x128xf32, #tpu.memory_space<vmem>>, %arg7: memref<1x128xf32, #tpu.memory_space<vmem>>) attributes {dimension_semantics = [#tpu.dimension_semantics<parallel>, #tpu.dimension_semantics<arbitrary>], iteration_bounds = array<i64: 2, 2>, scalar_prefetch = 0 : i64, scratch_operands = 3 : i64, tpu.core_type = #tpu.core_type<tc>, window_params = [{transform_indices = @transform_0, window_bounds = array<i64: 128, 64>}, {transform_indices = @transform_1, window_bounds = array<i64: 128, 64>}, {transform_indices = @transform_2, window_bounds = array<i64: 1, 128>}]} {
    %c0_i32 = arith.constant 0 : i32
    %0 = arith.cmpi eq, %arg1, %c0_i32 : i32
    %1 = arith.extui %0 : i1 to i32
    %c0_i32_0 = arith.constant 0 : i32
    %2 = arith.cmpi ne, %1, %c0_i32_0 : i32
    scf.if %2 {
      %cst_18 = arith.constant 0xFF800000 : f32
      %38 = vector.broadcast %cst_18 : f32 to vector<1x128xf32>
      %c0_19 = arith.constant 0 : index
      %c0_20 = arith.constant 0 : index
      %39 = vector.load %arg5[%c0_19, %c0_20] : memref<1x128xf32, #tpu.memory_space<vmem>>, vector<1x128xf32>
      tpu.vector_store %arg5[%c0_19, %c0_20], %38 {strides = array<i32>} : memref<1x128xf32, #tpu.memory_space<vmem>>, vector<1x128xf32>,
      %cst_21 = arith.constant 0.000000e+00 : f32
      %40 = vector.broadcast %cst_21 : f32 to vector<1x128xf32>
      %c0_22 = arith.constant 0 : index
      %c0_23 = arith.constant 0 : index
      %41 = vector.load %arg6[%c0_22, %c0_23] : memref<1x128xf32, #tpu.memory_space<vmem>>, vector<1x128xf32>
      tpu.vector_store %arg6[%c0_22, %c0_23], %40 {strides = array<i32>} : memref<1x128xf32, #tpu.memory_space<vmem>>, vector<1x128xf32>,
    } else {
    }
    %c0 = arith.constant 0 : index
    %c0_1 = arith.constant 0 : index
    %3 = vector.load %arg3[%c0, %c0_1] : memref<128x64xf32, #tpu.memory_space<vmem>>, vector<128x64xf32>
    %c0_2 = arith.constant 0 : index
    %c0_3 = arith.constant 0 : index
    %4 = vector.load %arg2[%c0_2, %c0_3] : memref<128x64xf32, #tpu.memory_space<vmem>>, vector<128x64xf32>
    %cst = arith.constant dense<0.000000e+00> : vector<128x128xf32>
    %5 = tpu.matmul %3, %4, %cst {dimension_numbers = #tpu.dot_dimension_numbers<[1], [1], [0], [0], [0, 0, 1, 0], [], []>} : vector<128x64xf32>, vector<128x64xf32>, vector<128x128xf32> -> vector<128x128xf32>
    %cst_4 = arith.constant 1.000000e+01 : f32
    %6 = vector.broadcast %cst_4 : f32 to vector<128x128xf32>
    %7 = arith.mulf %5, %6 : vector<128x128xf32>
    %c128_i32 = arith.constant 128 : i32
    %8 = arith.muli %arg1, %c128_i32 : i32
    %9 = tpu.iota {dimensions = array<i32: 0>} : vector<128x128xi32>
    %10 = vector.broadcast %8 : i32 to vector<128x128xi32>
    %11 = arith.addi %10, %9 : vector<128x128xi32>
    %c200_i32 = arith.constant 200 : i32
    %12 = vector.broadcast %c200_i32 : i32 to vector<128x128xi32>
    %13 = arith.cmpi slt, %11, %12 : vector<128x128xi32>
    %cst_5 = arith.constant -3.40282347E+38 : f32
    %14 = vector.broadcast %cst_5 : f32 to vector<128x128xf32>
    %15 = arith.select %13, %7, %14 : vector<128x128xi1>, vector<128x128xf32>
    %16 = arith.cmpi eq, %arg1, %arg0 : i32
    %17 = arith.extui %16 : i1 to i32
    %c0_i32_6 = arith.constant 0 : i32
    %18 = arith.cmpi ne, %17, %c0_i32_6 : i32
    scf.if %18 {
      %38 = tpu.iota {dimensions = array<i32: 0>} : vector<128x128xi32>
      %39 = tpu.iota {dimensions = array<i32: 1>} : vector<128x128xi32>
      %40 = arith.cmpi eq, %38, %39 : vector<128x128xi32>
      %cst_18 = arith.constant 0.000000e+00 : f32
      %41 = vector.broadcast %cst_18 : f32 to vector<128x128xf32>
      %42 = arith.select %40, %15, %41 : vector<128x128xi1>, vector<128x128xf32>
      %cst_19 = arith.constant dense<0.000000e+00> : vector<128xf32>
      %43 = vector.multi_reduction <add>, %42, %cst_19 [0] : vector<128x128xf32> to vector<128xf32>
      %44 = vector.shape_cast %43 : vector<128xf32> to vector<1x128xf32>
      %c0_20 = arith.constant 0 : index
      %c0_21 = arith.constant 0 : index
      %45 = vector.load %arg7[%c0_20, %c0_21] : memref<1x128xf32, #tpu.memory_space<vmem>>, vector<1x128xf32>
      tpu.vector_store %arg7[%c0_20, %c0_21], %44 {strides = array<i32>} : memref<1x128xf32, #tpu.memory_space<vmem>>, vector<1x128xf32>,
    } else {
    }
    %c0_7 = arith.constant 0 : index
    %c0_8 = arith.constant 0 : index
    %19 = vector.load %arg5[%c0_7, %c0_8] : memref<1x128xf32, #tpu.memory_space<vmem>>, vector<1x128xf32>
    %cst_9 = arith.constant dense<0xFF800000> : vector<128xf32>
    %20 = vector.multi_reduction <maximumf>, %15, %cst_9 [0] : vector<128x128xf32> to vector<128xf32>
    %21 = vector.shape_cast %20 : vector<128xf32> to vector<1x128xf32>
    %22 = arith.maximumf %19, %21 : vector<1x128xf32>
    %23 = vector.broadcast %22 : vector<1x128xf32> to vector<128x128xf32>
    %24 = arith.subf %15, %23 : vector<128x128xf32>
    %25 = math.exp %24 : vector<128x128xf32>
    %26 = arith.subf %19, %22 : vector<1x128xf32>
    %27 = math.exp %26 : vector<1x128xf32>
    %c0_10 = arith.constant 0 : index
    %c0_11 = arith.constant 0 : index
    %28 = vector.load %arg6[%c0_10, %c0_11] : memref<1x128xf32, #tpu.memory_space<vmem>>, vector<1x128xf32>
    %29 = arith.mulf %27, %28 : vector<1x128xf32>
    %cst_12 = arith.constant dense<0.000000e+00> : vector<128xf32>
    %30 = vector.multi_reduction <add>, %25, %cst_12 [0] : vector<128x128xf32> to vector<128xf32>
    %31 = vector.shape_cast %30 : vector<128xf32> to vector<1x128xf32>
    %32 = arith.addf %29, %31 : vector<1x128xf32>
    %c0_13 = arith.constant 0 : index
    %c0_14 = arith.constant 0 : index
    %33 = vector.load %arg6[%c0_13, %c0_14] : memref<1x128xf32, #tpu.memory_space<vmem>>, vector<1x128xf32>
    tpu.vector_store %arg6[%c0_13, %c0_14], %32 {strides = array<i32>} : memref<1x128xf32, #tpu.memory_space<vmem>>, vector<1x128xf32>,
    %c0_15 = arith.constant 0 : index
    %c0_16 = arith.constant 0 : index
    %34 = vector.load %arg5[%c0_15, %c0_16] : memref<1x128xf32, #tpu.memory_space<vmem>>, vector<1x128xf32>
    tpu.vector_store %arg5[%c0_15, %c0_16], %22 {strides = array<i32>} : memref<1x128xf32, #tpu.memory_space<vmem>>, vector<1x128xf32>,
    %c1_i32 = arith.constant 1 : i32
    %35 = arith.cmpi eq, %arg1, %c1_i32 : i32
    %36 = arith.extui %35 : i1 to i32
    %c0_i32_17 = arith.constant 0 : i32
    %37 = arith.cmpi ne, %36, %c0_i32_17 : i32
    scf.if %37 {
      %c0_18 = arith.constant 0 : index
      %c0_19 = arith.constant 0 : index
      %38 = vector.load %arg5[%c0_18, %c0_19] : memref<1x128xf32, #tpu.memory_space<vmem>>, vector<1x128xf32>
      %c0_20 = arith.constant 0 : index
      %c0_21 = arith.constant 0 : index
      %39 = vector.load %arg6[%c0_20, %c0_21] : memref<1x128xf32, #tpu.memory_space<vmem>>, vector<1x128xf32>
      %40 = math.log %39 : vector<1x128xf32>
      %41 = arith.addf %38, %40 : vector<1x128xf32>
      %c0_22 = arith.constant 0 : index
      %c0_23 = arith.constant 0 : index
      %42 = vector.load %arg7[%c0_22, %c0_23] : memref<1x128xf32, #tpu.memory_space<vmem>>, vector<1x128xf32>
      %43 = arith.subf %41, %42 : vector<1x128xf32>
      %c0_24 = arith.constant 0 : index
      %c0_25 = arith.constant 0 : index
      %44 = vector.load %arg4[%c0_24, %c0_25] : memref<1x128xf32, #tpu.memory_space<vmem>>, vector<1x128xf32>
      tpu.vector_store %arg4[%c0_24, %c0_25], %43 {strides = array<i32>} : memref<1x128xf32, #tpu.memory_space<vmem>>, vector<1x128xf32>,
    } else {
    }
    return
  }
  func.func @transform_0(%arg0: i32, %arg1: i32) -> (i32, i32) {
    %c0_i32 = arith.constant 0 : i32
    %c0_i32_0 = arith.constant 0 : i32
    return %arg0, %c0_i32 : i32, i32
  }
  func.func @transform_1(%arg0: i32, %arg1: i32) -> (i32, i32) {
    %c0_i32 = arith.constant 0 : i32
    %c0_i32_0 = arith.constant 0 : i32
    return %arg1, %c0_i32 : i32, i32
  }
  func.func @transform_2(%arg0: i32, %arg1: i32) -> (i32, i32) {
    %c0_i32 = arith.constant 0 : i32
    %c0_i32_0 = arith.constant 0 : i32
    return %c0_i32, %arg0 : i32, i32
  }
}

</mosaic_0001>

<bundles_post_ra>
// kernel: tpu_custom_call.1
= control target key start
LH: loop header
LB: loop body
LE: loop exit
PB: predicated region body
PF: predicated region fallthrough
CT: control target
= control target key end

     0   :  { %7 = vsyncpa [#allocation6], 0  ;;  %s1650_s0 = inlined_call_operand.vmem [shape: f32[256,64], index: 0, kind: input, shape index: {}]   ;;  %s1651_s1 = inlined_call_operand.vmem [shape: f32[256,64], index: 1, kind: input, shape index: {}]   ;;  %s1652_s2 = inlined_call_operand.hbm [shape: f32[1,256], index: 2, kind: output, shape index: {}]  }
   0x1   :  { %9 = vsyncpa [#allocation6 + $0x1], 0  ;;  %s1198_s9 = smov 0   ;;  %s1200_s10 = smov 0  }
   0x2   :  { %s1202_s11 = smov 0   ;;  %s1204_s12 = smov 0  }
   0x3   :  { %s1206_s13 = smov 0   ;;  %s1208_s14 = smov 0  }
   0x4   :  { %s1210_s15 = smov 0   ;;  %s1212_s16 = smov 0  }
   0x5 LB: > { %s809_s17 = sadd.s32 4294967295, %s1178_s16   ;;  %s810_s18 = sadd.s32 4294967294, %s1178_s16   ;;  %s1178_s16 = sphi %s1212_s16, %s15_s16   ;;  %s1174_s15 = sphi %s1210_s15, %s1661_s15   ;;  %s1170_s14 = sphi %s1208_s14, %s1660_s14   ;;  %s1166_s13 = sphi %s1206_s13, %s1659_s13   ;;  %s1162_s12 = sphi %s1204_s12, %s1658_s12   ;;  %s1158_s11 = sphi %s1202_s11, %s1657_s11   ;;  %s1154_s10 = sphi %s1200_s10, %s1656_s10   ;;  %s1150_s9 = sphi %s1198_s9, %s1655_s9  }
   0x6   : > { %s24_s19 = sadd.s32 1, %s1170_s14  ;;  %s27_s20 = sadd.s32 1, %s1174_s15 }
   0x7   : > { %p25_p0 = scmp.ge.s32.totalorder %s24_s19, 2  ;;  %p96_p1 = scmp.ne.s32.totalorder %s1158_s11, %s1154_s10 }
   0x8   : > { %p97_p2 = scmp.eq.s32.totalorder %s809_s17, 3  ;;  %p102_p4 = scmp.ne.s32.totalorder %s1154_s10, %s1150_s9 }
   0x9   : > { %s1663_s19 = smov (%p25_p0, %s24_s19), 0  ;;  %s1665_s20 = smov (!%p25_p0, %s27_s20), %s1174_s15 }
   0xa   : > { %p1247_p3 = por %p97_p2, %p96_p1  ;;  %p29_p5 = scmp.ge.s32.totalorder %s1665_s20, 2 }
   0xb   : > { %p103_p6 = scmp.eq.s32.totalorder %s810_s18, 3  ;;  %p813_p7 = scmp.ge.s32.totalorder %s1178_s16, 1 }
   0xc   : > { %p139_p8 = scmp.lt.s32.totalorder %s1178_s16, 5  ;;  %s1667_s20 = smov (%p29_p5, %s1665_s20), 0 }
   0xd   : > { %p1257_p9 = por %p103_p6, %p102_p4  ;;  %s83_s23 = ssub.s32 %s1174_s15, %s1667_s20 }
   0xe   : > { %p140_p10 = pnand %p813_p7, %p139_p8  ;;  %s86_s24 = sadd.s32 1, %s1158_s11 }
   0xf   : > { %p84_p11 = scmp.eq.s32.totalorder %s83_s23, 0  ;;  %s163_s26 = sand.u32 (!%p140_p10), 1, %s1154_s10  }
  0x10   : > { %143 = sbr.rel (%p140_p10) target bundleno = 493 (0x1ed), region = 28  ;;  %s1269_s27 = sshll.u32 (!%p140_p10), %s1166_s13, 4 }
  0x11   : > { %s1265_s25 = scalar_select %p84_p11, %s1158_s11, %s86_s24  }
  0x12   : > { %p166_p12 = scmp.lt.s32.totalorder (!%p140_p10), %s1269_s27, 31  ;;  %s816_s28 = sshll.u32 (!%p140_p10), %s1162_s12, 4 }
  0x13   : > { %p172_p13 = scmp.lt.s32.totalorder (!%p140_p10), %s816_s28, 31  ;;  %s1286_s18 = scalar_lea.vmem (!%p140_p10), [#allocation5], %s163_s26 }
  0x14   : > { %p818_p0 = scmp.ne.s32.totalorder (!%p140_p10), %s1162_s12, 0 }
  0x15   : > { %s167_s29 = scalar_select %p166_p12, %s1269_s27, 31 }
  0x16   : > { %s1669_s28 = smov (!%p172_p13, %s816_s28), 31  ;;  %180 = sbr.rel (%p818_p0) target bundleno = 29 (0x1d), region = 32 }
  0x17   : > { %s815_s30 = sshll.u32 %s167_s29, 3  ;;  %s817_s6 = sshll.u32 %s1669_s28, 3 }
  0x18   : > { %s1277_s5 = scalar_lea.vmem %s1650_s0, %s815_s30  ;;  %s1282_s17 = scalar_lea.vmem %s1651_s1, %s817_s6 }
  0x1b   : > { %v1180_v0 = vmov -inf   ;;  %v1181_v1 = vmov 0.0  }
  0x1c   : > { %181 = vst [vmem:[#allocation2] sm:$0x1] %v1180_v0  ;;  %182 = vst [vmem:[#allocation3] sm:$0x1] %v1181_v1 }
  0x1d PF: > { %v214_v2 = vld [vmem:[%s1277_s5 + $0x78] sm:$0xff]  ;;  %vm215_vm0 = vcmask 523264   ;;  %v213_v3 = vld [vmem:[%s1277_s5 + $0x70] sm:$0xff]  ;;  %v212_v4 = vld [vmem:[%s1277_s5 + $0x68] sm:$0xff]  ;;  %v474_v34 = vlaneseq  ;;  %s851_s23 = sshll.u32 %s1162_s12, 7  ;;  %p852_p1 = scmp.ne.s32.totalorder %s1162_s12, %s1166_s13 }
  0x1e   : > { %889 = vmatprep.subr.msk.mxu0 %vm215_vm0, %v214_v2  ;;  %945 = vmatprep.subr.msk.mxu1 %vm215_vm0, %v214_v2  ;;  %v183_v5 = vld [vmem:[%s1282_s17] sm:$0xff]  ;;  %v210_v8 = vld [vmem:[%s1277_s5 + $0x58] sm:$0xff]  ;;  %v209_v9 = vld [vmem:[%s1277_s5 + $0x50] sm:$0xff]  ;;  %v1411_v38 = vstv %s851_s23 }
  0x1f   : > { %890 = vmatpush3.xpose.msk.msra.mxu0 %vm215_vm0, %v214_v2  ;;  %961 = vmatpush3.xpose.msk.msra.mxu1 %vm215_vm0, %v214_v2  ;;  %v191_v6 = vld [vmem:[%s1282_s17 + $0x40] sm:$0xff]  ;;  %v208_v10 = vld [vmem:[%s1277_s5 + $0x48] sm:$0xff]  ;;  %v206_v12 = vld [vmem:[%s1277_s5 + $0x38] sm:$0xff]  ;;  %v1402_v35 = vshrl.u32 %v474_v34, 7 }
  0x20   : > { %891 = vmatprep.subr.msk.mxu0 %vm215_vm0, %v213_v3  ;;  %946 = vmatprep.subr.msk.mxu1 %vm215_vm0, %v213_v3  ;;  %v211_v7 = vld [vmem:[%s1277_s5 + $0x60] sm:$0xff]  ;;  %v205_v13 = vld [vmem:[%s1277_s5 + $0x30] sm:$0xff]  ;;  %v204_v14 = vld [vmem:[%s1277_s5 + $0x28] sm:$0xff] }
  0x21   : > { %921 = vmatprep.mubr.msk.f32.mxu0 %vm215_vm0, %v183_v5  ;;  %933 = vmatprep.mubr.msk.f32.mxu1 %vm215_vm0, %v191_v6  ;;  %v207_v11 = vld [vmem:[%s1277_s5 + $0x40] sm:$0xff]  ;;  %v202_v16 = vld [vmem:[%s1277_s5 + $0x18] sm:$0xff]  ;;  %v201_v17 = vld [vmem:[%s1277_s5 + $0x10] sm:$0xff]  ;;  %v1406_v36 = vadd.s32 8, %v1402_v35  ;;  %v1409_v37 = vadd.s32 72, %v1402_v35  ;;  %v1414_v39 = vadd.s32 64, %v1402_v35  ;;  %v492_v46 = vadd.s32 %v1411_v38, %v1402_v35 }
  0x22   : > { %v203_v15 = vld [vmem:[%s1277_s5 + $0x20] sm:$0xff]  ;;  %v200_v18 = vld [vmem:[%s1277_s5 + $0x8] sm:$0xff]  ;;  %v185_v22 = vld [vmem:[%s1282_s17 + $0x10] sm:$0xff]  ;;  %v1417_v40 = vadd.s32 24, %v1402_v35  ;;  %v1420_v41 = vadd.s32 88, %v1402_v35  ;;  %v1423_v42 = vadd.s32 16, %v1402_v35 }
  0x23   : > { %892 = vmatpush3.xpose.msk.msra.mxu0 %vm215_vm0, %v213_v3  ;;  %962 = vmatpush3.xpose.msk.msra.mxu1 %vm215_vm0, %v213_v3  ;;  %v199_v19 = vld [vmem:[%s1277_s5] sm:$0xff]  ;;  %v184_v20 = vld [vmem:[%s1282_s17 + $0x8] sm:$0xff]  ;;  %v193_v23 = vld [vmem:[%s1282_s17 + $0x50] sm:$0xff]  ;;  %v1426_v43 = vadd.s32 80, %v1402_v35  ;;  %v493_v44 = vadd.s32 %v1411_v38, %v1406_v36  ;;  %v501_v45 = vadd.s32 %v1411_v38, %v1409_v37  ;;  %v500_v47 = vadd.s32 %v1411_v38, %v1414_v39 }
  0x24   : > { %893 = vmatprep.subr.msk.mxu0 %vm215_vm0, %v212_v4  ;;  %947 = vmatprep.subr.msk.mxu1 %vm215_vm0, %v212_v4  ;;  %v192_v21 = vld [vmem:[%s1282_s17 + $0x48] sm:$0xff]  ;;  %v186_v24 = vld [vmem:[%s1282_s17 + $0x18] sm:$0xff]  ;;  %v187_v26 = vld [vmem:[%s1282_s17 + $0x20] sm:$0xff]  ;;  %v495_v48 = vadd.s32 %v1411_v38, %v1417_v40  ;;  %v503_v49 = vadd.s32 %v1411_v38, %v1420_v41  ;;  %v494_v50 = vadd.s32 %v1411_v38, %v1423_v42  ;;  %vm508_vm3 = vcmp.lt.s32.totalorder %v492_v46, 200 }
  0x25   : > { %v194_v25 = vld [vmem:[%s1282_s17 + $0x58] sm:$0xff]  ;;  %v195_v27 = vld [vmem:[%s1282_s17 + $0x60] sm:$0xff]  ;;  %v188_v28 = vld [vmem:[%s1282_s17 + $0x28] sm:$0xff]  ;;  %v502_v51 = vadd.s32 %v1411_v38, %v1426_v43  ;;  %vm509_vm1 = vcmp.lt.s32.totalorder %v493_v44, 200  ;;  %vm517_vm2 = vcmp.lt.s32.totalorder %v501_v45, 200  ;;  %vm516_vm4 = vcmp.lt.s32.totalorder %v500_v47, 200 }
  0x26   : > { %v196_v29 = vld [vmem:[%s1282_s17 + $0x68] sm:$0xff]  ;;  %v189_v30 = vld [vmem:[%s1282_s17 + $0x30] sm:$0xff]  ;;  %v190_v32 = vld [vmem:[%s1282_s17 + $0x38] sm:$0xff]  ;;  %v1445_v54 = vadd.s32 40, %v1402_v35  ;;  %v1448_v55 = vadd.s32 104, %v1402_v35  ;;  %vm511_vm5 = vcmp.lt.s32.totalorder %v495_v48, 200 }
  0x27   : > { %894 = vmatpush3.xpose.msk.msra.mxu0 %vm215_vm0, %v212_v4  ;;  %963 = vmatpush3.xpose.msk.msra.mxu1 %vm215_vm0, %v212_v4  ;;  %v197_v31 = vld [vmem:[%s1282_s17 + $0x70] sm:$0xff]  ;;  %v198_v33 = vld [vmem:[%s1282_s17 + $0x78] sm:$0xff]  ;;  %vm519_vm6 = vcmp.lt.s32.totalorder %v503_v49, 200  ;;  %vm510_vm7 = vcmp.lt.s32.totalorder %v494_v50, 200  ;;  %vm518_vm8 = vcmp.lt.s32.totalorder %v502_v51, 200  ;;  %v1451_v60 = vadd.s32 32, %v1402_v35 }
  0x28   : > { %895 = vmatprep.subr.msk.mxu0 %vm215_vm0, %v211_v7  ;;  %948 = vmatprep.subr.msk.mxu1 %vm215_vm0, %v211_v7  ;;  %v1454_v61 = vadd.s32 96, %v1402_v35  ;;  %v497_v4 = vadd.s32 %v1411_v38, %v1445_v54  ;;  %v505_v5 = vadd.s32 %v1411_v38, %v1448_v55  ;;  %v1467_v6 = vadd.s32 56, %v1402_v35 }
  0x2a   : > { %vm513_vm9 = vcmp.lt.s32.totalorder %v497_v4, 200  ;;  %vm521_vm10 = vcmp.lt.s32.totalorder %v505_v5, 200 }
  0x2b   : > { %896 = vmatpush3.xpose.msk.msra.mxu0 %vm215_vm0, %v211_v7  ;;  %964 = vmatpush3.xpose.msk.msra.mxu1 %vm215_vm0, %v211_v7  ;;  %v1470_v7 = vadd.s32 120, %v1402_v35 }
  0x2c   : > { %897 = vmatprep.subr.msk.mxu0 %vm215_vm0, %v210_v8  ;;  %949 = vmatprep.subr.msk.mxu1 %vm215_vm0, %v210_v8 }
  0x2f   : > { %898 = vmatpush3.xpose.msk.msra.mxu0 %vm215_vm0, %v210_v8  ;;  %965 = vmatpush3.xpose.msk.msra.mxu1 %vm215_vm0, %v210_v8 }
  0x30   : > { %899 = vmatprep.subr.msk.mxu0 %vm215_vm0, %v209_v9  ;;  %950 = vmatprep.subr.msk.mxu1 %vm215_vm0, %v209_v9 }
  0x33   : > { %900 = vmatpush3.xpose.msk.msra.mxu0 %vm215_vm0, %v209_v9  ;;  %966 = vmatpush3.xpose.msk.msra.mxu1 %vm215_vm0, %v209_v9 }
  0x34   : > { %901 = vmatprep.subr.msk.mxu0 %vm215_vm0, %v208_v10  ;;  %951 = vmatprep.subr.msk.mxu1 %vm215_vm0, %v208_v10 }
  0x37   : > { %902 = vmatpush3.xpose.msk.msra.mxu0 %vm215_vm0, %v208_v10  ;;  %967 = vmatpush3.xpose.msk.msra.mxu1 %vm215_vm0, %v208_v10 }
  0x38   : > { %903 = vmatprep.subr.msk.mxu0 %vm215_vm0, %v207_v11  ;;  %952 = vmatprep.subr.msk.mxu1 %vm215_vm0, %v207_v11 }
  0x3b   : > { %904 = vmatpush3.xpose.msk.msra.mxu0 %vm215_vm0, %v207_v11  ;;  %968 = vmatpush3.xpose.msk.msra.mxu1 %vm215_vm0, %v207_v11 }
  0x3c   : > { %905 = vmatprep.subr.msk.mxu0 %vm215_vm0, %v206_v12  ;;  %953 = vmatprep.subr.msk.mxu1 %vm215_vm0, %v206_v12 }
  0x3f   : > { %906 = vmatpush3.xpose.msk.msra.mxu0 %vm215_vm0, %v206_v12  ;;  %969 = vmatpush3.xpose.msk.msra.mxu1 %vm215_vm0, %v206_v12 }
  0x40   : > { %907 = vmatprep.subr.msk.mxu0 %vm215_vm0, %v205_v13  ;;  %954 = vmatprep.subr.msk.mxu1 %vm215_vm0, %v205_v13 }
  0x43   : > { %908 = vmatpush3.xpose.msk.msra.mxu0 %vm215_vm0, %v205_v13  ;;  %970 = vmatpush3.xpose.msk.msra.mxu1 %vm215_vm0, %v205_v13 }
  0x44   : > { %909 = vmatprep.subr.msk.mxu0 %vm215_vm0, %v204_v14  ;;  %955 = vmatprep.subr.msk.mxu1 %vm215_vm0, %v204_v14 }
  0x47   : > { %910 = vmatpush3.xpose.msk.msra.mxu0 %vm215_vm0, %v204_v14  ;;  %971 = vmatpush3.xpose.msk.msra.mxu1 %vm215_vm0, %v204_v14  ;;  %v496_v14 = vadd.s32 %v1411_v38, %v1451_v60 }
  0x48   : > { %911 = vmatprep.subr.msk.mxu0 %vm215_vm0, %v203_v15  ;;  %956 = vmatprep.subr.msk.mxu1 %vm215_vm0, %v203_v15 }
  0x49   : > { %vm512_vm11 = vcmp.lt.s32.totalorder %v496_v14, 200 }
  0x4b   : > { %912 = vmatpush3.xpose.msk.msra.mxu0 %vm215_vm0, %v203_v15  ;;  %972 = vmatpush3.xpose.msk.msra.mxu1 %vm215_vm0, %v203_v15  ;;  %v504_v15 = vadd.s32 %v1411_v38, %v1454_v61 }
  0x4c   : > { %913 = vmatprep.subr.msk.mxu0 %vm215_vm0, %v202_v16  ;;  %957 = vmatprep.subr.msk.mxu1 %vm215_vm0, %v202_v16 }
  0x4d   : > { %vm520_vm12 = vcmp.lt.s32.totalorder %v504_v15, 200 }
  0x4f   : > { %914 = vmatpush3.xpose.msk.msra.mxu0 %vm215_vm0, %v202_v16  ;;  %973 = vmatpush3.xpose.msk.msra.mxu1 %vm215_vm0, %v202_v16  ;;  %v1483_v16 = vadd.s32 48, %v1402_v35 }
  0x50   : > { %915 = vmatprep.subr.msk.mxu0 %vm215_vm0, %v201_v17  ;;  %958 = vmatprep.subr.msk.mxu1 %vm215_vm0, %v201_v17 }
  0x53   : > { %916 = vmatpush3.xpose.msk.msra.mxu0 %vm215_vm0, %v201_v17  ;;  %974 = vmatpush3.xpose.msk.msra.mxu1 %vm215_vm0, %v201_v17  ;;  %v1486_v17 = vadd.s32 112, %v1402_v35 }
  0x54   : > { %917 = vmatprep.subr.msk.mxu0 %vm215_vm0, %v200_v18  ;;  %959 = vmatprep.subr.msk.mxu1 %vm215_vm0, %v200_v18 }
  0x57   : > { %918 = vmatpush3.xpose.msk.msra.mxu0 %vm215_vm0, %v200_v18  ;;  %975 = vmatpush3.xpose.msk.msra.mxu1 %vm215_vm0, %v200_v18 }
  0x58   : > { %919 = vmatprep.subr.msk.mxu0 %vm215_vm0, %v199_v19  ;;  %960 = vmatprep.subr.msk.mxu1 %vm215_vm0, %v199_v19 }
  0x5b   : > { %920 = vmatpush3.xpose.msk.msra.mxu0 %vm215_vm0, %v199_v19  ;;  %976 = vmatpush3.xpose.msk.msra.mxu1 %vm215_vm0, %v199_v19 }
  0x5e   : > { %922 = vmatmul.mubr.msk.f32.vlgmr.msra.gmra.mxu0 %vm215_vm0, %v184_v20  ;;  %934 = vmatmul.mubr.msk.f32.vlgmr.msra.gmra.mxu1 %vm215_vm0, %v192_v21 }
  0x5f   : > { %924 = vmatprep.mubr.msk.f32.mxu0 %vm215_vm0, %v185_v22  ;;  %936 = vmatprep.mubr.msk.f32.mxu1 %vm215_vm0, %v193_v23 }
  0x62   : > { %925 = vmatmul.mubr.msk.f32.gmra.mxu0 %vm215_vm0, %v186_v24  ;;  %937 = vmatmul.mubr.msk.f32.gmra.mxu1 %vm215_vm0, %v194_v25  ;;  %v499_v24 = vadd.s32 %v1411_v38, %v1467_v6  ;;  %v507_v25 = vadd.s32 %v1411_v38, %v1470_v7 }
  0x63   : > { %927 = vmatprep.mubr.msk.f32.mxu0 %vm215_vm0, %v187_v26  ;;  %939 = vmatprep.mubr.msk.f32.mxu1 %vm215_vm0, %v195_v27 }
  0x64   : > { %vm515_vm13 = vcmp.lt.s32.totalorder %v499_v24, 200  ;;  %vm523_vm14 = vcmp.lt.s32.totalorder %v507_v25, 200 }
  0x66   : > { %928 = vmatmul.mubr.msk.f32.gmra.mxu0 %vm215_vm0, %v188_v28  ;;  %940 = vmatmul.mubr.msk.f32.gmra.mxu1 %vm215_vm0, %v196_v29 }
  0x67   : > { %930 = vmatprep.mubr.msk.f32.mxu0 %vm215_vm0, %v189_v30  ;;  %942 = vmatprep.mubr.msk.f32.mxu1 %vm215_vm0, %v197_v31 }
  0x6a   : > { %931 = vmatmul.mubr.msk.f32.gmra.mxu0 %vm215_vm0, %v190_v32  ;;  %943 = vmatmul.mubr.msk.f32.gmra.mxu1 %vm215_vm0, %v198_v33  ;;  %v498_v32 = vadd.s32 %v1411_v38, %v1483_v16  ;;  %v506_v33 = vadd.s32 %v1411_v38, %v1486_v17 }
  0x6c   : > { %vm514_vm15 = vcmp.lt.s32.totalorder %v498_v32, 200  ;;  %vm522_vm0 = vcmp.lt.s32.totalorder %v506_v33, 200 }
 0x11e   : > { %v923_v52 = vpop.f32.mrf.mxu0  ;;  %v935_v53 = vpop.f32.mrf.mxu1 }
 0x11f   : > { %v458_v56 = vmul.f32 10.0, %v923_v52  ;;  %v466_v57 = vmul.f32 10.0, %v935_v53 }
 0x120   : > { %v378_v58 = vpop.f32.mrf.mxu0  ;;  %v418_v59 = vpop.f32.mrf.mxu1 }
 0x121   : > { %v1457_v62 = vsel %vm509_vm1, %v458_v56, -3.4028235e+38  ;;  %v1460_v63 = vsel %vm517_vm2, %v466_v57, -3.4028235e+38  ;;  %v457_v0 = vmul.f32 10.0, %v378_v58  ;;  %v465_v1 = vmul.f32 10.0, %v418_v59 }
 0x122   : > { %v926_v2 = vpop.f32.mrf.mxu0  ;;  %v938_v3 = vpop.f32.mrf.mxu1 }
 0x123   : > { %v1473_v8 = vsel %vm508_vm3, %v457_v0, -3.4028235e+38  ;;  %v1476_v9 = vsel %vm516_vm4, %v465_v1, -3.4028235e+38  ;;  %v460_v10 = vmul.f32 10.0, %v926_v2  ;;  %v468_v11 = vmul.f32 10.0, %v938_v3 }
 0x124   : > { %v388_v12 = vpop.f32.mrf.mxu0  ;;  %v428_v13 = vpop.f32.mrf.mxu1 }
 0x125   : > { %v1489_v18 = vsel %vm511_vm5, %v460_v10, -3.4028235e+38  ;;  %v1492_v19 = vsel %vm519_vm6, %v468_v11, -3.4028235e+38  ;;  %v459_v20 = vmul.f32 10.0, %v388_v12  ;;  %v467_v21 = vmul.f32 10.0, %v428_v13 }
 0x126   : > { %v929_v22 = vpop.f32.mrf.mxu0  ;;  %v941_v23 = vpop.f32.mrf.mxu1 }
 0x127   : > { %v1499_v26 = vsel %vm510_vm7, %v459_v20, -3.4028235e+38  ;;  %v1502_v27 = vsel %vm518_vm8, %v467_v21, -3.4028235e+38  ;;  %v462_v28 = vmul.f32 10.0, %v929_v22  ;;  %v470_v29 = vmul.f32 10.0, %v941_v23 }
 0x128   : > { %v398_v30 = vpop.f32.mrf.mxu0  ;;  %v438_v31 = vpop.f32.mrf.mxu1 }
 0x129   : > { %v1508_v44 = vsel %vm513_vm9, %v462_v28, -3.4028235e+38  ;;  %v1510_v45 = vsel %vm521_vm10, %v470_v29, -3.4028235e+38  ;;  %v461_v46 = vmul.f32 10.0, %v398_v30  ;;  %v469_v47 = vmul.f32 10.0, %v438_v31 }
 0x12a   : > { %v932_v48 = vpop.f32.mrf.mxu0  ;;  %v944_v49 = vpop.f32.mrf.mxu1 }
 0x12b   : > { %v1512_v50 = vsel %vm512_vm11, %v461_v46, -3.4028235e+38  ;;  %v1514_v51 = vsel %vm520_vm12, %v469_v47, -3.4028235e+38  ;;  %v464_v52 = vmul.f32 10.0, %v932_v48  ;;  %v472_v53 = vmul.f32 10.0, %v944_v49 }
 0x12c   : > { %v408_v56 = vpop.f32.mrf.mxu0  ;;  %v448_v57 = vpop.f32.mrf.mxu1  ;;  %543 = sbr.rel (%p852_p1) target bundleno = 352 (0x160), region = 36 }
 0x12d   : > { %v1516_v38 = vsel %vm515_vm13, %v464_v52, -3.4028235e+38  ;;  %v1518_v58 = vsel %vm523_vm14, %v472_v53, -3.4028235e+38  ;;  %v463_v59 = vmul.f32 10.0, %v408_v56  ;;  %v471_v0 = vmul.f32 10.0, %v448_v57 }
 0x12f   : > { %v1520_v1 = vsel %vm514_vm15, %v463_v59, -3.4028235e+38  ;;  %v1522_v2 = vsel %vm522_vm0, %v471_v0, -3.4028235e+38 }
 0x131   : > { %v545_v3 = vand.u32 127, %v474_v34 }
 0x133   : > { %vm546_vm1 = vcmp.eq.s32.totalorder %v1402_v35, %v545_v3  ;;  %vm547_vm2 = vcmp.eq.s32.totalorder %v1406_v36, %v545_v3  ;;  %vm548_vm3 = vcmp.eq.s32.totalorder %v1423_v42, %v545_v3  ;;  %vm549_vm4 = vcmp.eq.s32.totalorder %v1417_v40, %v545_v3 }
 0x134   : > { %v562_v4 = vsel %vm546_vm1, %v1473_v8, 0.0  ;;  %v563_v5 = vsel %vm547_vm2, %v1457_v62, 0.0  ;;  %v564_v10 = vsel %vm548_vm3, %v1499_v26, 0.0  ;;  %vm550_vm5 = vcmp.eq.s32.totalorder %v1451_v60, %v545_v3 }
 0x135   : > { %v578_v11 = vadd.f32 %v563_v5, %v562_v4  ;;  %v565_v12 = vsel %vm549_vm4, %v1489_v18, 0.0  ;;  %vm551_vm6 = vcmp.eq.s32.totalorder %v1445_v54, %v545_v3  ;;  %v566_v36 = vsel %vm550_vm5, %v1512_v50, 0.0 }
 0x136   : > { %vm552_vm7 = vcmp.eq.s32.totalorder %v1483_v16, %v545_v3  ;;  %v567_v13 = vsel %vm551_vm6, %v1508_v44, 0.0  ;;  %vm553_vm8 = vcmp.eq.s32.totalorder %v1467_v6, %v545_v3  ;;  %vm554_vm9 = vcmp.eq.s32.totalorder %v1414_v39, %v545_v3 }
 0x137   : > { %v579_v34 = vadd.f32 %v578_v11, %v564_v10  ;;  %v568_v14 = vsel %vm552_vm7, %v1520_v1, 0.0  ;;  %v569_v15 = vsel %vm553_vm8, %v1516_v38, 0.0  ;;  %vm555_vm10 = vcmp.eq.s32.totalorder %v1409_v37, %v545_v3 }
 0x138   : > { %v570_v20 = vsel %vm554_vm9, %v1476_v9, 0.0  ;;  %vm556_vm11 = vcmp.eq.s32.totalorder %v1426_v43, %v545_v3  ;;  %v571_v21 = vsel %vm555_vm10, %v1460_v63, 0.0  ;;  %vm557_vm12 = vcmp.eq.s32.totalorder %v1420_v41, %v545_v3 }
 0x139   : > { %v580_v42 = vadd.f32 %v579_v34, %v565_v12  ;;  %v572_v22 = vsel %vm556_vm11, %v1502_v27, 0.0  ;;  %vm558_vm13 = vcmp.eq.s32.totalorder %v1454_v61, %v545_v3  ;;  %v573_v23 = vsel %vm557_vm12, %v1492_v19, 0.0 }
 0x13a   : > { %vm559_vm14 = vcmp.eq.s32.totalorder %v1448_v55, %v545_v3  ;;  %v574_v24 = vsel %vm558_vm13, %v1514_v51, 0.0  ;;  %vm560_vm15 = vcmp.eq.s32.totalorder %v1486_v17, %v545_v3  ;;  %vm561_vm0 = vcmp.eq.s32.totalorder %v1470_v7, %v545_v3 }
 0x13b   : > { %v581_v40 = vadd.f32 %v580_v42, %v566_v36  ;;  %v575_v25 = vsel %vm559_vm14, %v1510_v45, 0.0  ;;  %v576_v28 = vsel %vm560_vm15, %v1522_v2, 0.0  ;;  %v577_v61 = vsel %vm561_vm0, %v1518_v58, 0.0 }
 0x13d   : > { %v582_v60 = vadd.f32 %v581_v40, %v567_v13 }
 0x13f   : > { %v583_v54 = vadd.f32 %v582_v60, %v568_v14 }
 0x141   : > { %v584_v16 = vadd.f32 %v583_v54, %v569_v15 }
 0x143   : > { %v585_v6 = vadd.f32 %v584_v16, %v570_v20 }
 0x145   : > { %v586_v39 = vadd.f32 %v585_v6, %v571_v21 }
 0x147   : > { %v587_v37 = vadd.f32 %v586_v39, %v572_v22 }
 0x149   : > { %v588_v43 = vadd.f32 %v587_v37, %v573_v23 }
 0x14b   : > { %v589_v41 = vadd.f32 %v588_v43, %v574_v24 }
 0x14d   : > { %v590_v29 = vadd.f32 %v589_v41, %v575_v25 }
 0x14f   : > { %v591_v30 = vadd.f32 %v590_v29, %v576_v28 }
 0x151   : > { %v592_v31 = vadd.f32 %v591_v30, %v577_v61 }
 0x153   : > { %v593_v32 = vrot.slane %v592_v31, 4 }
 0x155   : > { %v594_v55 = vadd.f32 %v593_v32, %v592_v31 }
 0x157   : > { %v595_v33 = vrot.slane %v594_v55, 2 }
 0x159   : > { %v596_v46 = vadd.f32 %v595_v33, %v594_v55 }
 0x15b   : > { %v597_v47 = vrot.slane %v596_v46, 1 }
 0x15d   : > { %v598_v48 = vadd.f32 %v597_v47, %v596_v46 }
 0x15f   : > { %599 = vst [vmem:[#allocation4] sm:$0x1] %v598_v48 }
 0x160 PF: > { %v601_v17 = vmax.f32 %v1473_v8, %v1512_v50  ;;  %v602_v7 = vmax.f32 %v1457_v62, %v1508_v44  ;;  %v603_v49 = vmax.f32 %v1499_v26, %v1520_v1  ;;  %v604_v52 = vmax.f32 %v1489_v18, %v1516_v38  ;;  %v1575_v14 = vld [vmem:[#allocation2] sm:$0x1]  ;;  %p853_p2 = scmp.ne.s32.totalorder %s1162_s12, 1 }
 0x161   : > { %v626_v15 = vsub.s32 0, %v1402_v35 }
 0x162   : > { %v605_v53 = vmax.f32 %v601_v17, %v1476_v9  ;;  %v606_v56 = vmax.f32 %v602_v7, %v1460_v63  ;;  %v607_v57 = vmax.f32 %v603_v49, %v1502_v27  ;;  %v608_v59 = vmax.f32 %v604_v52, %v1492_v19 }
 0x164   : > { %v609_v0 = vmax.f32 %v605_v53, %v1514_v51  ;;  %v610_v3 = vmax.f32 %v606_v56, %v1510_v45  ;;  %v611_v4 = vmax.f32 %v607_v57, %v1522_v2  ;;  %v612_v5 = vmax.f32 %v608_v59, %v1518_v58 }
 0x166   : > { %v613_v10 = vmax.f32 %v609_v0, %v610_v3  ;;  %v614_v11 = vmax.f32 %v611_v4, %v612_v5 }
 0x168   : > { %v615_v12 = vmax.f32 %v613_v10, %v614_v11 }
 0x16a   : > { %v616_v34 = vrot.slane %v615_v12, 4 }
 0x16c   : > { %v617_v36 = vmax.f32 %v615_v12, %v616_v34 }
 0x16e   : > { %v618_v42 = vrot.slane %v617_v36, 2 }
 0x170   : > { %v619_v13 = vmax.f32 %v617_v36, %v618_v42 }
 0x172   : > { %v620_v40 = vrot.slane %v619_v13, 1 }
 0x174   : > { %v621_v60 = vmax.f32 %v619_v13, %v620_v40 }
 0x176   : > { %v1579_v54 = vmax.f32 %v1575_v14, %v621_v60 }
 0x178   : > { %v627_v20 = vrot.slane %v1579_v54, %v626_v15  ;;  %705 = vst [vmem:[#allocation2] sm:$0x1] %v1579_v54 }
 0x17a   : > { %v629_v16 = vsub.f32 %v1473_v8, %v627_v20  ;;  %v630_v21 = vsub.f32 %v1457_v62, %v627_v20  ;;  %v631_v6 = vsub.f32 %v1499_v26, %v627_v20  ;;  %v632_v22 = vsub.f32 %v1489_v18, %v627_v20 }
 0x17b   : > { %v633_v39 = vsub.f32 %v1512_v50, %v627_v20  ;;  %v634_v24 = vsub.f32 %v1508_v44, %v627_v20  ;;  %v635_v25 = vsub.f32 %v1520_v1, %v627_v20  ;;  %v636_v62 = vsub.f32 %v1516_v38, %v627_v20 }
 0x17c   : > { %v645_v23 = vmul.f32 1.442695, %v629_v16  ;;  %v647_v37 = vmul.f32 1.442695, %v630_v21  ;;  %v649_v35 = vmul.f32 1.442695, %v631_v6  ;;  %v637_v18 = vsub.f32 %v1476_v9, %v627_v20 }
 0x17d   : > { %v651_v43 = vmul.f32 1.442695, %v632_v22  ;;  %v653_v41 = vmul.f32 1.442695, %v633_v39  ;;  %v655_v8 = vmul.f32 1.442695, %v634_v24  ;;  %v638_v50 = vsub.f32 %v1460_v63, %v627_v20 }
 0x17e   : > { %1050 = vpow2.f32 %v645_v23  ;;  %v657_v26 = vmul.f32 1.442695, %v635_v25  ;;  %v659_v28 = vmul.f32 1.442695, %v636_v62  ;;  %v639_v44 = vsub.f32 %v1502_v27, %v627_v20 }
 0x17f   : > { %1052 = vpow2.f32 %v647_v37  ;;  %v661_v29 = vmul.f32 1.442695, %v637_v18  ;;  %v640_v1 = vsub.f32 %v1492_v19, %v627_v20  ;;  %v663_v61 = vmul.f32 1.442695, %v638_v50 }
 0x180   : > { %1054 = vpow2.f32 %v649_v35  ;;  %v641_v38 = vsub.f32 %v1514_v51, %v627_v20  ;;  %v665_v31 = vmul.f32 1.442695, %v639_v44  ;;  %v642_v55 = vsub.f32 %v1510_v45, %v627_v20 }
 0x181   : > { %1056 = vpow2.f32 %v651_v43  ;;  %v667_v63 = vmul.f32 1.442695, %v640_v1  ;;  %v643_v27 = vsub.f32 %v1522_v2, %v627_v20  ;;  %v644_v17 = vsub.f32 %v1518_v58, %v627_v20 }
 0x182   : > { %1058 = vpow2.f32 %v653_v41  ;;  %v669_v47 = vmul.f32 1.442695, %v641_v38  ;;  %v671_v51 = vmul.f32 1.442695, %v642_v55  ;;  %v677_v58 = vsub.f32 %v1575_v14, %v1579_v54  ;;  %v680_v54 = vld [vmem:[#allocation3] sm:$0x1] }
 0x183   : > { %1060 = vpow2.f32 %v655_v8  ;;  %v673_v52 = vmul.f32 1.442695, %v643_v27  ;;  %v675_v56 = vmul.f32 1.442695, %v644_v17 }
 0x184   : > { %1062 = vpow2.f32 %v657_v26  ;;  %v678_v34 = vmul.f32 1.442695, %v677_v58 }
 0x185   : > { %1064 = vpow2.f32 %v659_v28 }
 0x186   : > { %1066 = vpow2.f32 %v661_v29 }
 0x187   : > { %1068 = vpow2.f32 %v663_v61 }
 0x188   : > { %1070 = vpow2.f32 %v665_v31 }
 0x189   : > { %1072 = vpow2.f32 %v667_v63 }
 0x18a   : > { %1074 = vpow2.f32 %v669_v47 }
 0x18b   : > { %v1051_v30 = vpop.eup %1050  ;;  %1076 = vpow2.f32 %v671_v51 }
 0x18c   : > { %v1053_v9 = vpop.eup %1052  ;;  %1078 = vpow2.f32 %v673_v52 }
 0x18d   : > { %v1055_v32 = vpop.eup %1054  ;;  %v682_v33 = vadd.f32 %v1053_v9, %v1051_v30  ;;  %1080 = vpow2.f32 %v675_v56 }
 0x18e   : > { %v1057_v46 = vpop.eup %1056  ;;  %1082 = vpow2.f32 %v678_v34 }
 0x18f   : > { %v683_v19 = vadd.f32 %v1055_v32, %v682_v33  ;;  %v1059_v48 = vpop.eup %1058 }
 0x190   : > { %v1061_v49 = vpop.eup %1060 }
 0x191   : > { %v684_v7 = vadd.f32 %v1057_v46, %v683_v19  ;;  %v1063_v45 = vpop.eup %1062 }
 0x192   : > { %v1065_v59 = vpop.eup %1064 }
 0x193   : > { %v685_v53 = vadd.f32 %v1059_v48, %v684_v7  ;;  %v1067_v0 = vpop.eup %1066 }
 0x194   : > { %v1069_v4 = vpop.eup %1068 }
 0x195   : > { %v686_v57 = vadd.f32 %v1061_v49, %v685_v53  ;;  %v1071_v10 = vpop.eup %1070 }
 0x196   : > { %v1073_v12 = vpop.eup %1072 }
 0x197   : > { %v687_v2 = vadd.f32 %v1063_v45, %v686_v57  ;;  %v1075_v42 = vpop.eup %1074 }
 0x198   : > { %v1077_v40 = vpop.eup %1076 }
 0x199   : > { %v688_v3 = vadd.f32 %v1065_v59, %v687_v2  ;;  %v1079_v15 = vpop.eup %1078 }
 0x19a   : > { %v1081_v16 = vpop.eup %1080 }
 0x19b   : > { %v689_v5 = vadd.f32 %v1067_v0, %v688_v3  ;;  %v1083_v14 = vpop.eup %1082 }
 0x19c   : > { %v681_v35 = vmul.f32 %v1083_v14, %v680_v54 }
 0x19d   : > { %v690_v11 = vadd.f32 %v1069_v4, %v689_v5 }
 0x19f   : > { %v691_v36 = vadd.f32 %v1071_v10, %v690_v11 }
 0x1a1   : > { %v692_v13 = vadd.f32 %v1073_v12, %v691_v36 }
 0x1a3   : > { %v693_v60 = vadd.f32 %v1075_v42, %v692_v13 }
 0x1a5   : > { %v694_v20 = vadd.f32 %v1077_v40, %v693_v60 }
 0x1a7   : > { %v695_v21 = vadd.f32 %v1079_v15, %v694_v20 }
 0x1a9   : > { %v696_v6 = vadd.f32 %v1081_v16, %v695_v21 }
 0x1ab   : > { %v697_v22 = vrot.slane %v696_v6, 4 }
 0x1ad   : > { %v698_v39 = vadd.f32 %v697_v22, %v696_v6 }
 0x1af   : > { %v699_v23 = vrot.slane %v698_v39, 2 }
 0x1b1   : > { %v700_v37 = vadd.f32 %v699_v23, %v698_v39 }
 0x1b3   : > { %v701_v24 = vrot.slane %v700_v37, 1 }
 0x1b5   : > { %v702_v43 = vadd.f32 %v701_v24, %v700_v37  ;;  %709 = sbr.rel (%p853_p2) target bundleno = 470 (0x1d6), region = 40 }
 0x1b7   : > { %v703_v25 = vadd.f32 %v702_v43, %v681_v35 }
 0x1b9   : > { %704 = vst [vmem:[#allocation3] sm:$0x1] %v703_v25 }
 0x1ba   : > { %v710_v8 = vld [vmem:[#allocation2] sm:$0x1]  ;;  %v715_v26 = vld [vmem:[#allocation4] sm:$0x1] }
 0x1c0   : > { %v711_v41 = vld [vmem:[#allocation3] sm:$0x1] }
 0x1c1   : > { %1084 = vlog2.f32 %v711_v41 }
 0x1ce   : > { %v1085_v62 = vpop.eup %1084 }
 0x1cf   : > { %v713_v18 = vmul.f32 0.6931472, %v1085_v62 }
 0x1d1   : > { %v714_v50 = vadd.f32 %v713_v18, %v710_v8 }
 0x1d3   : > { %v716_v28 = vsub.f32 %v714_v50, %v715_v26 }
 0x1d5   : > { %717 = vst [vmem:[%s1286_s18] sm:$0x1] %v716_v28 }
 0x1d6 PF: > { %s729_s12 = scalar_lea.hbm %s1652_s2, %s1269_s27  ;;  %s731_s28 = sshll.u32 %s1286_s18, 4  ;;  %s732_s28 = int_to_ptr.vmem [resolvable:$true] %s731_s28 }
 0x1d7   : > { %s719_s29 = scalar_lea.sflag [#allocation6], %s163_s26  ;;  %s1086_s30 = scalar_lea.vmem %s732_s28, 16 }
 0x1d8   : > { %p1087_p4 = scmp.ne.s32.totalorder %s732_s28, %s1086_s30  ;;  %s1182_s3 = smov [#allocation5]  }
 0x1d9   : > { %s1090_s4 = sshll.u32 %s1182_s3, 4  ;;  %s1091_s4 = int_to_ptr.vmem [resolvable:$false] %s1090_s4 }
 0x1da   : > { %p1088_p5 = pnand %p1087_p4, %p1247_p3  ;;  %s1092_s5 = scalar_lea.vmem %s1091_s4, 32 }
 0x1db   : > { %p1093_p7 = scmp.lt.s32.totalorder %s732_s28, %s1091_s4  ;;  %p1094_p8 = scmp.lt.s32.totalorder %s1092_s5, %s1086_s30 }
 0x1dc   : > { %p1089_p6 = pneg %p1088_p5 }
 0x1dd   : > { %p1095_p10 = por %p1094_p8, %p1093_p7 }
 0x1df   : > { %p1096_p11 = pnand %p1095_p10, %p1089_p6 }
 0x1e1   : > { %1099 = shalt.err (!%p1096_p11)
}
 0x1e2   : > { %s1100_s6 = scalar_lea.hbm %s729_s12, 16  ;;  %s1104_s7 = scalar_lea.hbm %s1652_s2, 32 }
 0x1e3   : > { %p1101_p12 = scmp.ne.s32.totalorder %s729_s12, %s1100_s6  ;;  %p1105_p1 = scmp.lt.s32.totalorder %s729_s12, %s1652_s2 }
 0x1e4   : > { %p1106_p2 = scmp.lt.s32.totalorder %s1104_s7, %s1100_s6 }
 0x1e5   : > { %p1102_p13 = pnand %p1101_p12, %p1247_p3 }
 0x1e6   : > { %p1107_p4 = por %p1106_p2, %p1105_p1 }
 0x1e7   : > { %p1103_p0 = pneg %p1102_p13 }
 0x1e9   : > { %p1108_p5 = pnand %p1107_p4, %p1103_p0 }
 0x1eb   : > { %1111 = shalt.err (!%p1108_p5)
}
 0x1ec   : > { %977 = dma.vmem_to_hbm [thread:$0]  (%p1247_p3), %s732_s28, 16, %s729_s12, %s719_s29  }
 0x1ed PF: > { %p983_p6 = scmp.ge.s32.totalorder %s1178_s16, 2  ;;  %s743_s18 = sand.u32 1, %s1150_s9  }
 0x1ee   : > { %s744_s23 = scalar_lea.sflag [#allocation6], %s743_s18 }
 0x1ef   : > { %p980_p7 = pnand %p983_p6, %p1257_p9 }
 0x1f1   : > { %p981_p8 = pneg %p980_p7 }
 0x1f3   : > { %1145 = dma.done.wait (%p981_p8), %s744_s23, 16  }
 0x1f4   : > { %1147 = vsyncadd (%p981_p8), %s744_s23, 4294967280  ;;  %s15_s16 = sadd.s32 1, %s1178_s16   ;;  %s1655_s9 = smov %s1154_s10 }
 0x1f5   : > { %p12_p10 = scmp.ge.s32.totalorder %s15_s16, 6   ;;  %s1656_s10 = smov %s1158_s11 }
 0x1f6   : > { %s1657_s11 = smov %s1265_s25  ;;  %s1658_s12 = smov %s1170_s14 }
 0x1f7   : > { %s1659_s13 = smov %s1174_s15  ;;  %s1660_s14 = smov %s1663_s19 }
 0x1f8   : > { %s1661_s15 = smov %s1667_s20  ;;  %14 = sbr.rel (!%p12_p10) target bundleno = 5 (0x5), region = 78 }
 0x1fd   :  { %748 = vsyncpa [#allocation6], 1 }
 0x1fe   :  { %750 = vsyncpa [#allocation6 + $0x1], 1 }

</bundles_post_ra>
